<compile_context>
chip_gen: v6e
topology: v6e:2x2x1
jax: 0.10.0
libtpu: 0.0.40
codegen_flags: <defaults>
</compile_context>

<pallas_src>
import math

import jax
import jax.numpy as jnp
from jax.experimental import pallas as pl
from jax.experimental.pallas import tpu as pltpu


def _round_up(x: int, n: int) -> int:
    return ((x + n - 1) // n) * n


def _cdiv(a: int, b: int) -> int:
    return -(-a // b)


# ---------------------------------------------------------------------------
# Generation-aware VMEM budgets.
# ---------------------------------------------------------------------------
_VMEM_LIMIT_CACHE = None


def _vmem_limit_bytes() -> int:
    """vmem_limit_bytes: ~3/4 of physical VMEM, capped at 96 MiB.

    v7x (64 MiB/TC) -> 48 MiB; v5e/v6e (128 MiB) -> 96 MiB.  Falls back to the
    smallest generation's size if the hardware query is unavailable.
    """
    global _VMEM_LIMIT_CACHE
    if _VMEM_LIMIT_CACHE is None:
        try:
            phys = int(pltpu.get_tpu_info().vmem_capacity_bytes)
        except Exception:  # no TPU info available: assume v7x-sized VMEM
            phys = 64 * 1024 * 1024
        _VMEM_LIMIT_CACHE = min(phys * 3 // 4, 96 * 1024 * 1024)
    return _VMEM_LIMIT_CACHE


def _tile_budget_bytes() -> int:
    """Budget used for tile sizing (leave headroom under vmem_limit_bytes)."""
    return _vmem_limit_bytes() * 85 // 100


# ---------------------------------------------------------------------------
# Kernels.
# ---------------------------------------------------------------------------
def _resident_kernel(x_ref, w_ref, b_ref, o_ref):
    # x_ref: (tm, K) row tile; w_ref: (K, N) resident; b_ref: (1, N) resident.
    acc = jnp.dot(x_ref[...], w_ref[...], preferred_element_type=jnp.float32)
    # Single fused add+cast+store epilogue: one pass over the output tile so
    # v5e's single vector-store slot never becomes the binding unit.
    o_ref[...] = (acc + b_ref[...]).astype(o_ref.dtype)


def _ksplit_kernel(x_ref, w_ref, b_ref, o_ref, acc_ref):
    # Grid = (M tiles, K tiles); K is the innermost (reduction) axis.
    k = pl.program_id(1)

    @pl.when(k == 0)
    def _():
        acc_ref[...] = jnp.zeros_like(acc_ref)

    acc_ref[...] += jnp.dot(x_ref[...], w_ref[...],
                            preferred_element_type=jnp.float32)

    @pl.when(k == pl.num_programs(1) - 1)
    def _():
        o_ref[...] = (acc_ref[...] + b_ref[...]).astype(o_ref.dtype)


# ---------------------------------------------------------------------------
# Tile sizing.
# ---------------------------------------------------------------------------
def _pick_tm(m: int, k: int, n: int, x_bytes: int, w_bytes: int,
             out_bytes: int, budget: int, single_buffer_w: bool) -> int:
    """Row tile for the resident-weight path.  `m` is already 8-aligned."""
    w_copies = 1 if single_buffer_w else 2
    fixed = w_copies * (k * n * w_bytes + n * 4)       # resident weight + bias
    per_row = 2 * (k * x_bytes + n * out_bytes)        # dbl-buffered x + out rows
    avail = max(budget - fixed, 0)
    tm = min(1024, (avail // max(per_row, 1)) // 8 * 8)
    tm = max(8, min(tm, m))
    if m >= 16:                                        # >=2 grid steps when possible:
        tm = min(tm, _round_up(_cdiv(m, 2), 8))        # pipelining + v7x megacore
    if x_bytes == 2 and tm >= 16:                      # bf16 sublane packing
        tm -= tm % 16
    return tm


def _pick_ksplit_tiles(m: int, k_pad: int, n: int, x_bytes: int, w_bytes: int,
                       out_bytes: int, budget: int) -> tuple:
    """(tm, tk) for the K-split path.  `m` is 8-aligned, k_pad is 128-aligned."""
    best = None
    for tk in (2048, 1024, 512, 256, 128):
        if k_pad % tk:
            continue
        fixed = 2 * (tk * n * w_bytes + n * 4)                    # streamed W + bias
        per_row = 2 * tk * x_bytes + 2 * n * out_bytes + n * 4    # x, out, f32 acc
        avail = budget - fixed
        if avail <= 0:
            continue
        tm = min(1024, (avail // max(per_row, 1)) // 8 * 8)
        tm = max(8, min(tm, m))
        if m >= 16:
            tm = min(tm, _round_up(_cdiv(m, 2), 8))
        if best is None or tm > best[0]:
            best = (tm, tk)
        if tm >= 256:
            break
    if best is None:
        # TODO(synk): add an N-tiling grid axis for embedding_dim too large for VMEM.
        raise ValueError("LinearEmbedding weight too large for VMEM even with K-split")
    return best


# ---------------------------------------------------------------------------
# pallas_call wrappers.
# ---------------------------------------------------------------------------
def _resident_call(x2, w, b, out_dtype, *, single_buffer: bool):
    m, k = x2.shape
    n = w.shape[1]
    x_bytes = x2.dtype.itemsize
    w_bytes = w.dtype.itemsize
    out_bytes = jnp.dtype(out_dtype).itemsize
    tm = _pick_tm(m, k, n, x_bytes, w_bytes, out_bytes,
                  _tile_budget_bytes(), single_buffer)
    grid_m = _cdiv(m, tm)

    def const_spec(shape):
        # Grid-invariant operand: single-buffer it; double-buffering a constant
        # block just wastes VMEM (matters most on v7x's 64 MiB/TC).
        if single_buffer:
            return pl.BlockSpec(shape, lambda i: (0, 0),
                                pipeline_mode=pl.Buffered(1))
        return pl.BlockSpec(shape, lambda i: (0, 0))

    cost = pl.CostEstimate(
        flops=2 * m * k * n,
        transcendentals=0,
        bytes_accessed=m * k * x_bytes + k * n * w_bytes + m * n * out_bytes + n * 4,
    )
    return pl.pallas_call(
        _resident_kernel,
        out_shape=jax.ShapeDtypeStruct((m, n), out_dtype),
        grid=(grid_m,),
        in_specs=[
            pl.BlockSpec((tm, k), lambda i: (i, 0)),   # pipelined x row tiles
            const_spec((k, n)),                        # resident weight
            const_spec((1, n)),                        # resident bias
        ],
        out_specs=pl.BlockSpec((tm, n), lambda i: (i, 0)),
        compiler_params=pltpu.CompilerParams(
            dimension_semantics=("parallel",),         # row tiles -> megacore shards
            vmem_limit_bytes=_vmem_limit_bytes()),
        cost_estimate=cost,
    )(x2, w, b)


def _ksplit_call(x2, w, b, out_dtype):
    m, k_pad = x2.shape
    n = w.shape[1]
    x_bytes = x2.dtype.itemsize
    w_bytes = w.dtype.itemsize
    out_bytes = jnp.dtype(out_dtype).itemsize
    tm, tk = _pick_ksplit_tiles(m, k_pad, n, x_bytes, w_bytes, out_bytes,
                                _tile_budget_bytes())
    grid = (_cdiv(m, tm), k_pad // tk)

    cost = pl.CostEstimate(
        flops=2 * m * k_pad * n,
        transcendentals=0,
        bytes_accessed=m * k_pad * x_bytes + k_pad * n * w_bytes
        + m * n * out_bytes + n * 4,
    )
    return pl.pallas_call(
        _ksplit_kernel,
        out_shape=jax.ShapeDtypeStruct((m, n), out_dtype),
        grid=grid,
        in_specs=[
            pl.BlockSpec((tm, tk), lambda i, kk: (i, kk)),   # streamed x tiles
            pl.BlockSpec((tk, n), lambda i, kk: (kk, 0)),    # streamed W K-slabs
            pl.BlockSpec((1, n), lambda i, kk: (0, 0)),      # bias
        ],
        out_specs=pl.BlockSpec((tm, n), lambda i, kk: (i, 0)),
        scratch_shapes=[pltpu.VMEM((tm, n), jnp.float32)],   # f32 accumulator
        compiler_params=pltpu.CompilerParams(
            dimension_semantics=("parallel", "arbitrary"),
            vmem_limit_bytes=_vmem_limit_bytes()),
        cost_estimate=cost,
    )(x2, w, b)


# ---------------------------------------------------------------------------
# Public forward / init.
# ---------------------------------------------------------------------------
_SINGLE_BUFFER_OK = None   # lazily probed: does this jax accept pl.Buffered(1)?


def linear_embedding_forward(x, params, session):
    """x: (batch, seq, in_dim[session]) -> (batch, seq, embedding_dim)."""
    global _SINGLE_BUFFER_OK
    p = params[session]
    w, b = p["w"], p["b"]
    in_dim, emb = p["in_dim"], p["emb"]
    batch, seq, xin = x.shape
    assert xin == in_dim, f"expected in_dim={in_dim}, got {xin}"

    m = batch * seq
    x2 = x.reshape(m, in_dim)
    if x2.dtype != w.dtype:
        x2 = x2.astype(w.dtype)   # bf16 params -> bf16 activations (f32 acc in-kernel)

    # Pad only what is strictly required: rows to a multiple of 8 (sublane) and
    # K only for K-split sessions (to the weight's 128-aligned K).  In the
    # common case (m % 8 == 0, resident weight) there is no extra HBM pass.
    m_pad = _round_up(m, 8)
    k_pad = w.shape[0] if p["ksplit"] else in_dim
    if (m_pad, k_pad) != (m, in_dim):
        x2 = jnp.pad(x2, ((0, m_pad - m), (0, k_pad - in_dim)))

    if p["ksplit"]:
        out = _ksplit_call(x2, w, b, x.dtype)
    elif _SINGLE_BUFFER_OK is None:
        try:
            out = _resident_call(x2, w, b, x.dtype, single_buffer=True)
            _SINGLE_BUFFER_OK = True
        except Exception:   # pl.Buffered(1) unsupported on this jax: fall back
            _SINGLE_BUFFER_OK = False
            out = _resident_call(x2, w, b, x.dtype, single_buffer=False)
    else:
        out = _resident_call(x2, w, b, x.dtype, single_buffer=_SINGLE_BUFFER_OK)

    if m_pad != m:
        out = out[:m]
    return out.reshape(batch, seq, emb)


def init_linear_embedding_params(sessions, in_dim, embedding_dim, key,
                                 param_dtype=jnp.float32, force_ksplit=()):
    """Init matching torch.nn.Linear (U(-1/sqrt(fan_in), 1/sqrt(fan_in))).

    Weights are stored pre-transposed as (in_dim, embedding_dim) so the kernel
    output is lane-contiguous.  Neither K nor N is padded in the common case,
    so the hot path has no extra HBM passes over x or out.  Sessions whose
    weight would not fit the per-generation VMEM budget (or listed in
    `force_ksplit`, for testing) store a 128-aligned-K weight and run the
    K-split accumulator kernel instead.
    """
    budget = _tile_budget_bytes()
    w_bytes = jnp.dtype(param_dtype).itemsize
    params = {}
    for i, session in enumerate(sessions):
        k_w, k_b = jax.random.split(jax.random.fold_in(key, i))
        d = in_dim[session]
        bound = 1.0 / math.sqrt(d)
        w = jax.random.uniform(k_w, (embedding_dim, d), jnp.float32, -bound, bound)
        b = jax.random.uniform(k_b, (embedding_dim,), jnp.float32, -bound, bound)

        # Resident path iff the (worst-case double-buffered) weight fits in half
        # the tile budget, leaving the other half for the x / out row tiles.
        resident_ok = 2 * d * embedding_dim * w_bytes <= budget // 2
        ksplit = (session in force_ksplit) or not resident_ok

        if ksplit:
            kp = _round_up(d, 128)
            wt = jnp.zeros((kp, embedding_dim), param_dtype)
            wt = wt.at[:d, :].set(w.T.astype(param_dtype))
        else:
            wt = w.T.astype(param_dtype)                 # (in_dim, emb), unpadded

        params[session] = {
            "w": wt,
            "b": b.reshape(1, embedding_dim).astype(jnp.float32),
            "in_dim": d,
            "emb": embedding_dim,
            "ksplit": ksplit,
        }
    return params


if __name__ == "__main__":
    sessions = ["monkey_a", "monkey_b", "monkey_c"]
    in_dim = {"monkey_a": 16, "monkey_b": 32, "monkey_c": 384}
    embedding_dim = 32
    batch, seq = 2, 8

    key = jax.random.PRNGKey(0)
    # monkey_c is forced through the K-split fallback so both kernel paths run.
    params = init_linear_embedding_params(sessions, in_dim, embedding_dim, key,
                                          force_ksplit=("monkey_c",))

    ok = True
    for idx, session in enumerate(sessions):
        kx = jax.random.fold_in(key, 1000 + idx)
        x = jax.random.normal(kx, (batch, seq, in_dim[session]), jnp.float32)

        y = jax.block_until_ready(linear_embedding_forward(x, params, session))
        assert y.shape == (batch, seq, embedding_dim)

        p = params[session]
        w_ref = p["w"][: p["in_dim"], : p["emb"]].astype(jnp.float32)
        b_ref = p["b"][0]
        y_ref = jnp.einsum("bsd,de->bse", x, w_ref,
                           precision=jax.lax.Precision.HIGHEST) + b_ref
        # Tolerance allows for the MXU evaluating f32 matmuls via bf16 passes
        # under default precision; indexing/bias bugs would be O(1) errors.
        ok &= bool(jnp.allclose(y, y_ref, atol=1e-2, rtol=1e-2))

    if ok:
        print("KERNEL_OK")
</pallas_src>

<mosaic_0001>
module attributes {stable_mosaic.version = 11 : i64} {
  func.func @_resident_kernel(%arg0: i32, %arg1: memref<8x16xf32, #tpu.memory_space<vmem>>, %arg2: memref<16x32xf32, #tpu.memory_space<vmem>>, %arg3: memref<1x32xf32, #tpu.memory_space<vmem>>, %arg4: memref<8x32xf32, #tpu.memory_space<vmem>>) attributes {dimension_semantics = [#tpu.dimension_semantics<parallel>], iteration_bounds = array<i64: 2>, scalar_prefetch = 0 : i64, scratch_operands = 0 : i64, tpu.core_type = #tpu.core_type<tc>, window_params = [{transform_indices = @transform_0, window_bounds = array<i64: 8, 16>}, {pipeline_mode = #tpu.pipeline_mode<synchronous>, transform_indices = @transform_1, window_bounds = array<i64: 16, 32>}, {pipeline_mode = #tpu.pipeline_mode<synchronous>, transform_indices = @transform_2, window_bounds = array<i64: 1, 32>}, {transform_indices = @transform_3, window_bounds = array<i64: 8, 32>}]} {
    %c0 = arith.constant 0 : index
    %c0_0 = arith.constant 0 : index
    %0 = vector.load %arg1[%c0, %c0_0] : memref<8x16xf32, #tpu.memory_space<vmem>>, vector<8x16xf32>
    %c0_1 = arith.constant 0 : index
    %c0_2 = arith.constant 0 : index
    %1 = vector.load %arg2[%c0_1, %c0_2] : memref<16x32xf32, #tpu.memory_space<vmem>>, vector<16x32xf32>
    %cst = arith.constant dense<0.000000e+00> : vector<8x32xf32>
    %2 = tpu.matmul %0, %1, %cst {dimension_numbers = #tpu.dot_dimension_numbers<[1], [0], [0], [1], [0, 0, 1, 1], [], []>} : vector<8x16xf32>, vector<16x32xf32>, vector<8x32xf32> -> vector<8x32xf32>
    %c0_3 = arith.constant 0 : index
    %c0_4 = arith.constant 0 : index
    %3 = vector.load %arg3[%c0_3, %c0_4] : memref<1x32xf32, #tpu.memory_space<vmem>>, vector<1x32xf32>
    %4 = vector.broadcast %3 : vector<1x32xf32> to vector<8x32xf32>
    %5 = arith.addf %2, %4 : vector<8x32xf32>
    %c0_5 = arith.constant 0 : index
    %c0_6 = arith.constant 0 : index
    %6 = vector.load %arg4[%c0_5, %c0_6] : memref<8x32xf32, #tpu.memory_space<vmem>>, vector<8x32xf32>
    tpu.vector_store %arg4[%c0_5, %c0_6], %5 {strides = array<i32>} : memref<8x32xf32, #tpu.memory_space<vmem>>, vector<8x32xf32>,
    return
  }
  func.func @transform_0(%arg0: i32) -> (i32, i32) {
    %c0_i32 = arith.constant 0 : i32
    %c0_i32_0 = arith.constant 0 : i32
    return %arg0, %c0_i32 : i32, i32
  }
  func.func @transform_1(%arg0: i32) -> (i32, i32) {
    %c0_i32 = arith.constant 0 : i32
    %c0_i32_0 = arith.constant 0 : i32
    %c0_i32_1 = arith.constant 0 : i32
    return %c0_i32, %c0_i32_0 : i32, i32
  }
  func.func @transform_2(%arg0: i32) -> (i32, i32) {
    %c0_i32 = arith.constant 0 : i32
    %c0_i32_0 = arith.constant 0 : i32
    %c0_i32_1 = arith.constant 0 : i32
    return %c0_i32, %c0_i32_0 : i32, i32
  }
  func.func @transform_3(%arg0: i32) -> (i32, i32) {
    %c0_i32 = arith.constant 0 : i32
    %c0_i32_0 = arith.constant 0 : i32
    return %arg0, %c0_i32 : i32, i32
  }
}

module attributes {stable_mosaic.version = 11 : i64} {
  func.func @_resident_kernel(%arg0: i32, %arg1: memref<8x16xf32, #tpu.memory_space<vmem>>, %arg2: memref<16x32xf32, #tpu.memory_space<vmem>>, %arg3: memref<1x32xf32, #tpu.memory_space<vmem>>, %arg4: memref<8x32xf32, #tpu.memory_space<vmem>>) attributes {dimension_semantics = [#tpu.dimension_semantics<parallel>], iteration_bounds = array<i64: 2>, scalar_prefetch = 0 : i64, scratch_operands = 0 : i64, tpu.core_type = #tpu.core_type<tc>, window_params = [{transform_indices = @transform_0, window_bounds = array<i64: 8, 16>}, {pipeline_mode = #tpu.pipeline_mode<synchronous>, transform_indices = @transform_1, window_bounds = array<i64: 16, 32>}, {pipeline_mode = #tpu.pipeline_mode<synchronous>, transform_indices = @transform_2, window_bounds = array<i64: 1, 32>}, {transform_indices = @transform_3, window_bounds = array<i64: 8, 32>}]} {
    %c0 = arith.constant 0 : index
    %c0_0 = arith.constant 0 : index
    %0 = vector.load %arg1[%c0, %c0_0] : memref<8x16xf32, #tpu.memory_space<vmem>>, vector<8x16xf32>
    %c0_1 = arith.constant 0 : index
    %c0_2 = arith.constant 0 : index
    %1 = vector.load %arg2[%c0_1, %c0_2] : memref<16x32xf32, #tpu.memory_space<vmem>>, vector<16x32xf32>
    %cst = arith.constant dense<0.000000e+00> : vector<8x32xf32>
    %2 = tpu.matmul %0, %1, %cst {dimension_numbers = #tpu.dot_dimension_numbers<[1], [0], [0], [1], [0, 0, 1, 1], [], []>} : vector<8x16xf32>, vector<16x32xf32>, vector<8x32xf32> -> vector<8x32xf32>
    %c0_3 = arith.constant 0 : index
    %c0_4 = arith.constant 0 : index
    %3 = vector.load %arg3[%c0_3, %c0_4] : memref<1x32xf32, #tpu.memory_space<vmem>>, vector<1x32xf32>
    %4 = vector.broadcast %3 : vector<1x32xf32> to vector<8x32xf32>
    %5 = arith.addf %2, %4 : vector<8x32xf32>
    %c0_5 = arith.constant 0 : index
    %c0_6 = arith.constant 0 : index
    %6 = vector.load %arg4[%c0_5, %c0_6] : memref<8x32xf32, #tpu.memory_space<vmem>>, vector<8x32xf32>
    tpu.vector_store %arg4[%c0_5, %c0_6], %5 {strides = array<i32>} : memref<8x32xf32, #tpu.memory_space<vmem>>, vector<8x32xf32>,
    return
  }
  func.func @transform_0(%arg0: i32) -> (i32, i32) {
    %c0_i32 = arith.constant 0 : i32
    %c0_i32_0 = arith.constant 0 : i32
    return %arg0, %c0_i32 : i32, i32
  }
  func.func @transform_1(%arg0: i32) -> (i32, i32) {
    %c0_i32 = arith.constant 0 : i32
    %c0_i32_0 = arith.constant 0 : i32
    %c0_i32_1 = arith.constant 0 : i32
    return %c0_i32, %c0_i32_0 : i32, i32
  }
  func.func @transform_2(%arg0: i32) -> (i32, i32) {
    %c0_i32 = arith.constant 0 : i32
    %c0_i32_0 = arith.constant 0 : i32
    %c0_i32_1 = arith.constant 0 : i32
    return %c0_i32, %c0_i32_0 : i32, i32
  }
  func.func @transform_3(%arg0: i32) -> (i32, i32) {
    %c0_i32 = arith.constant 0 : i32
    %c0_i32_0 = arith.constant 0 : i32
    return %arg0, %c0_i32 : i32, i32
  }
}

</mosaic_0001>

<bundles_post_ra>
// kernel: tpu_custom_call.1
= control target key start
LH: loop header
LB: loop body
LE: loop exit
PB: predicated region body
PF: predicated region fallthrough
CT: control target
= control target key end

     0   :  { %8 = vsyncpa [#allocation3], 0  ;;  %s782_s0 = inlined_call_operand.hbm [shape: f32[16,16], index: 0, kind: input, shape index: {}]   ;;  %s783_s1 = inlined_call_operand.hbm [shape: f32[16,32], index: 1, kind: input, shape index: {}]   ;;  %s784_s2 = inlined_call_operand.vmem [shape: f32[1,32], index: 2, kind: input, shape index: {}]   ;;  %s785_s3 = inlined_call_operand.hbm [shape: f32[16,32], index: 3, kind: output, shape index: {}]  }
   0x1   :  { %10 = vsyncpa [#allocation3 + $0x1], 0 }
   0x2   :  { %11 = vsyncpa [#allocation6], 0 }
   0x3   :  { %12 = vsyncpa [#allocation4], 0 }
   0x4   :  { %14 = vsyncpa [#allocation4 + $0x1], 0  ;;  %s619_s12 = smov 0   ;;  %s621_s13 = smov 0  }
   0x5   :  { %s623_s14 = smov 0   ;;  %s625_s15 = smov 0  }
   0x6 LB: > { %s640_s16 = sadd.s32 4294967295, %s590_s15   ;;  %s381_s17 = sadd.s32 4294967294, %s590_s15   ;;  %s590_s15 = sphi %s625_s15, %s807_s15   ;;  %s586_s14 = sphi %s623_s14, %s806_s14   ;;  %s582_s13 = sphi %s621_s13, %s805_s13   ;;  %s578_s12 = sphi %s619_s12, %s804_s12  }
   0x7   : > { %p40_p0 = scmp.ne.s32.totalorder %s582_s13, %s578_s12  ;;  %p786_p1 = scmp.eq.s32.totalorder %s640_s16, 0 }
   0x8   : > { %p112_p3 = scmp.eq.s32.totalorder %s381_s17, 1  ;;  %p382_p5 = scmp.ge.s32.totalorder %s590_s15, 1 }
   0x9   : > { %p649_p4 = por %p786_p1, %p40_p0  ;;  %p119_p7 = scmp.lt.s32.totalorder %s590_s15, 3 }
   0xa   : > { %p654_p6 = por %p112_p3, %p40_p0  ;;  %s592_s21 = smov [#allocation5]  }
   0xb   : > { %s790_s18 = scalar_select %p649_p4, 1, 0 }
   0xc   : > { %s791_s19 = scalar_select %p654_p6, 1, 0 }
   0xd   : > { %p659_p8 = pnand %p382_p5, %p119_p7  ;;  %s131_s22 = sshll.u32 %s592_s21, 4  ;;  %s132_s22 = int_to_ptr.vmem [resolvable:$true] %s131_s22 }
   0xe   : > { %s673_s24 = sadd.s32 1, %s590_s15   ;;  %s27_s25 = sadd.s32 1, %s586_s14 }
   0xf   : > { %s792_s20 = scalar_select %p659_p8, 1, 0 }
  0x10   : > { %p415_p9 = pneg %p659_p8  ;;  %s24_s26 = ssub.s32 %s590_s15, %s673_s24 }
  0x11   : > { %s479_s27 = scalar_lea.vmem %s132_s22, 256  ;;  %p487_p5 = scmp.lt.s32.totalorder %s132_s22, %s132_s22 }
  0x12   : > { %p668_p11 = pnand %p415_p9, %p786_p1  ;;  %p480_p13 = scmp.ne.s32.totalorder %s132_s22, %s479_s27 }
  0x13   : > { %p488_p7 = scmp.lt.s32.totalorder %s479_s27, %s479_s27 }
  0x14   : > { %p470_p12 = pneg %p668_p11 }
  0x15   : > { %p489_p10 = por %p488_p7, %p487_p5 }
  0x16   : > { %p482_p0 = pnand %p480_p13, %p470_p12 }
  0x18   : > { %p483_p3 = pneg %p482_p0 }
  0x1a   : > { %p490_p2 = pnand %p489_p10, %p483_p3 }
  0x1c   : > { %493 = shalt.err (!%p490_p2)
}
  0x1d   : > { %s593_s28 = smov 128   ;;  %s594_s29 = smov 8  }
  0x1e   : > { %418 = dma.hbm_to_vmem [thread:$0]  (!%p668_p11), %s783_s1, 256, %s132_s22, [#allocation6], %s593_s28, %s593_s28, %s594_s29  }
  0x1f   : > { %p25_p9 = scmp.eq.s32.totalorder %s24_s26, 0  ;;  %p34_p12 = scmp.ne.s32.totalorder %s586_s14, %s582_s13 }
  0x20   : > { %p35_p10 = scmp.eq.s32.totalorder %s590_s15, 0  ;;  %p428_p2 = scmp.lt.s32.totalorder %s590_s15, 2 }
  0x21   : > { %s690_s5 = scalar_select %p25_p9, %s586_s14, %s27_s25  }
  0x22   : > { %p36_p13 = por %p35_p10, %p34_p12  ;;  %p794_p0 = scmp.eq.s32.totalorder %s640_s16, 1 }
  0x23   : > { %s148_s7 = sand.u32 1, %s586_s14   ;;  %s386_s8 = sshll.u32 %s590_s15, 7 }
  0x24   : > { %p694_p3 = por %p794_p0, %p34_p12  ;;  %s385_s9 = sshll.u32 %s148_s7, 3 }
  0x25   : > { %s703_s17 = scalar_lea.hbm %s782_s0, %s386_s8  ;;  %s152_s21 = scalar_lea.vmem [#allocation2], %s385_s9 }
  0x26   : > { %s795_s6 = scalar_select %p694_p3, 1, 0 }
  0x27   : > { %s159_s22 = sshll.u32 %s152_s21, 4  ;;  %p705_p11 = pnand %p428_p2, %p36_p13  ;;  %s160_s22 = int_to_ptr.vmem [resolvable:$true] %s159_s22 }
  0x28   : > { %s149_s25 = scalar_lea.sflag [#allocation3], %s148_s7  ;;  %s494_s26 = scalar_lea.hbm %s703_s17, 128 }
  0x29   : > { %p495_p5 = scmp.ne.s32.totalorder %s703_s17, %s494_s26  ;;  %p496_p7 = pneg %p705_p11 }
  0x2a   : > { %s499_s29 = scalar_lea.hbm %s782_s0, 256  ;;  %p500_p10 = scmp.lt.s32.totalorder %s703_s17, %s782_s0 }
  0x2b   : > { %p497_p9 = pnand %p496_p7, %p495_p5  ;;  %p501_p2 = scmp.lt.s32.totalorder %s499_s29, %s494_s26 }
  0x2d   : > { %p498_p12 = pneg %p497_p9  ;;  %p502_p13 = por %p501_p2, %p500_p10 }
  0x2f   : > { %p503_p0 = pnand %p502_p13, %p498_p12 }
  0x31   : > { %506 = shalt.err (!%p503_p0)
}
  0x32   : > { %s507_s8 = scalar_lea.vmem %s160_s22, 128  ;;  %s595_s7 = smov [#allocation2]  }
  0x33   : > { %p508_p1 = scmp.ne.s32.totalorder %s160_s22, %s507_s8  ;;  %s512_s9 = sshll.u32 %s595_s7, 4  ;;  %s513_s9 = int_to_ptr.vmem [resolvable:$false] %s512_s9 }
  0x34   : > { %s514_s10 = scalar_lea.vmem %s513_s9, 256  ;;  %p515_p5 = scmp.lt.s32.totalorder %s160_s22, %s513_s9 }
  0x35   : > { %p510_p6 = pnand %p508_p1, %p496_p7  ;;  %p516_p9 = scmp.lt.s32.totalorder %s514_s10, %s507_s8 }
  0x37   : > { %p511_p3 = pneg %p510_p6  ;;  %p517_p4 = por %p516_p9, %p515_p5 }
  0x39   : > { %p518_p8 = pnand %p517_p4, %p511_p3 }
  0x3b   : > { %521 = shalt.err (!%p518_p8)
}
  0x3c   : > { %422 = dma.hbm_to_vmem [thread:$0]  (!%p705_p11), %s703_s17, 128, %s160_s22, %s149_s25  }
  0x3d   : > { %p797_p12 = scmp.ne.s32.totalorder %s792_s20, 0 }
  0x3e   : > { %s726_s11 = sand.u32 (!%p797_p12), 1, %s582_s13   ;;  %p798_p1 = scmp.ne.s32.totalorder (!%p797_p12), %s790_s18, 0 }
  0x3f   : > { %168 = sbr.rel (%p797_p12) target bundleno = 285 (0x11d), region = 32  ;;  %s388_s21 = sshll.u32 (!%p797_p12), %s726_s11, 3 }
  0x40   : > { %s171_s26 = scalar_lea.sflag (!%p797_p12), [#allocation3], %s726_s11  ;;  %s174_s27 = scalar_lea.vmem (!%p797_p12), [#allocation2], %s388_s21 }
  0x44   : > { %565 = dma.done.wait (%p798_p1), %s171_s26, 128  }
  0x45   : > { %567 = vsyncadd (%p798_p1), %s171_s26, 4294967168  ;;  %p799_p4 = scmp.eq.s32.totalorder %s640_s16, 0 }
  0x47   : > { %569 = dma.done.wait (%p799_p4), [#allocation6], 256   ;;  %p800_p6 = pmov %p799_p4 }
  0x48   : > { %v596_v0 = vmov 0.0   ;;  %vm597_vm0 = vmmov 0   ;;  %v203_v1 = vld [vmem:[#allocation5 + $0x8] sm:$0xff]  ;;  %v202_v2 = vld [vmem:[#allocation5] sm:$0xff]  ;;  %v201_v3 = vld [vmem:[%s174_s27] sm:$0xff]  ;;  %vm211_vm1 = vcmask 130048  }
  0x49   : > { %571 = vsyncadd (%p800_p6), [#allocation6], 4294967040  ;;  %400 = vmatprep.subr.mxu0 %v596_v0  ;;  %404 = vmatprep.mubr.msk.f32.mxu0 %vm597_vm0, %v596_v0  ;;  %v391_v4 = vld [vmem:[%s784_s2] ss:$0 sm:$0xff]  ;;  %s394_s17 = sshll.u32 %s640_s16, 7  ;;  %s200_s22 = scalar_lea.vmem [#allocation7], %s388_s21 }
  0x4a   : > { %401 = vmatpush3.msra.mxu0 %v203_v1  ;;  %s301_s23 = sshll.u32 %s200_s22, 4  ;;  %vm285_vm2 = vcmask 261120   ;;  %s745_s29 = scalar_lea.hbm %s785_s3, %s394_s17  ;;  %s302_s23 = int_to_ptr.vmem [resolvable:$true] %s301_s23 }
  0x4b   : > { %402 = vmatprep.subr.mxu0 %v596_v0  ;;  %s288_s30 = scalar_lea.sflag [#allocation4], %s726_s11  ;;  %s522_s4 = scalar_lea.vmem %s302_s23, 128 }
  0x4c   : > { %403 = vmatpush3.msra.mxu0 %v202_v2  ;;  %p523_p8 = scmp.ne.s32.totalorder %s302_s23, %s522_s4  ;;  %p801_p3 = scmp.ne.s32.totalorder %s795_s6, 0 }
  0x4d   : > { %405 = vmatmul.mubr.msk.f32.vlgmr.msra.gmra.mxu0 %vm211_vm1, %v201_v3  ;;  %s598_s16 = smov [#allocation7]  }
  0x4e   : > { %p524_p11 = pnand %p523_p8, %p801_p3  ;;  %s526_s8 = sshll.u32 %s598_s16, 4  ;;  %s527_s8 = int_to_ptr.vmem [resolvable:$false] %s526_s8 }
  0x4f   : > { %s528_s7 = scalar_lea.vmem %s527_s8, 256  ;;  %p529_p10 = scmp.lt.s32.totalorder %s302_s23, %s527_s8 }
  0x50   : > { %p525_p7 = pneg %p524_p11  ;;  %p530_p2 = scmp.lt.s32.totalorder %s528_s7, %s522_s4 }
  0x52   : > { %p531_p13 = por %p530_p2, %p529_p10 }
  0x54   : > { %p532_p0 = pnand %p531_p13, %p525_p7 }
 0x10d   : > { %v281_v5 = vpop.f32.mrf.mxu0 }
 0x10e   : > { %v282_v6 = vadd.f32 %v391_v4, %v281_v5 }
 0x10f   : > { %v406_v7 = vpop.f32.mrf.mxu0 }
 0x110   : > { %286 = vst.msk [vmem:[%s200_s22] sm:$0xff] %vm285_vm2, %v282_v6 }
 0x111   : > { %535 = shalt.err (!%p532_p0)
}
 0x112   : > { %s536_s9 = scalar_lea.hbm %s745_s29, 128  ;;  %s540_s21 = scalar_lea.hbm %s785_s3, 256 }
 0x113   : > { %p537_p5 = scmp.ne.s32.totalorder %s745_s29, %s536_s9  ;;  %p541_p1 = scmp.lt.s32.totalorder %s745_s29, %s785_s3 }
 0x114   : > { %p542_p4 = scmp.lt.s32.totalorder %s540_s21, %s536_s9 }
 0x115   : > { %p538_p9 = pnand %p537_p5, %p801_p3 }
 0x116   : > { %p543_p6 = por %p542_p4, %p541_p1 }
 0x117   : > { %p539_p12 = pneg %p538_p9 }
 0x119   : > { %p544_p8 = pnand %p543_p6, %p539_p12 }
 0x11b   : > { %547 = shalt.err (!%p544_p8)
}
 0x11c   : > { %413 = dma.vmem_to_hbm [thread:$0]  (%p801_p3), %s302_s23, 128, %s745_s29, %s288_s30  }
 0x11d PF: > { %s313_s18 = sand.u32 1, %s578_s12   ;;  %p802_p11 = scmp.ne.s32.totalorder %s791_s19, 0 }
 0x11e   : > { %p803_p7 = scmp.ge.s32.totalorder %s590_s15, 2  ;;  %s314_s20 = scalar_lea.sflag [#allocation4], %s313_s18 }
 0x120   : > { %p424_p10 = pnand %p803_p7, %p802_p11 }
 0x122   : > { %p425_p2 = pneg %p424_p10 }
 0x124   : > { %573 = dma.done.wait (%p425_p2), %s314_s20, 128  }
 0x125   : > { %575 = vsyncadd (%p425_p2), %s314_s20, 4294967168  ;;  %p17_p13 = scmp.ge.s32.totalorder %s673_s24, 4   ;;  %s804_s12 = smov %s582_s13 }
 0x126   : > { %s805_s13 = smov %s586_s14  ;;  %s806_s14 = smov %s690_s5 }
 0x127   : > { %s807_s15 = smov %s673_s24  ;;  %19 = sbr.rel (!%p17_p13) target bundleno = 6 (0x6), region = 81 }
 0x12c   :  { %319 = vsyncpa [#allocation3], 1 }
 0x12d   :  { %321 = vsyncpa [#allocation3 + $0x1], 1 }
 0x12e   :  { %322 = vsyncpa [#allocation6], 1 }
 0x12f   :  { %323 = vsyncpa [#allocation4], 1 }
 0x130   :  { %325 = vsyncpa [#allocation4 + $0x1], 1 }

// kernel: tpu_custom_call.1
= control target key start
LH: loop header
LB: loop body
LE: loop exit
PB: predicated region body
PF: predicated region fallthrough
CT: control target
= control target key end

     0   :  { %8 = vsyncpa [#allocation3], 0  ;;  %s782_s0 = inlined_call_operand.hbm [shape: f32[16,16], index: 0, kind: input, shape index: {}]   ;;  %s783_s1 = inlined_call_operand.hbm [shape: f32[16,32], index: 1, kind: input, shape index: {}]   ;;  %s784_s2 = inlined_call_operand.vmem [shape: f32[1,32], index: 2, kind: input, shape index: {}]   ;;  %s785_s3 = inlined_call_operand.hbm [shape: f32[16,32], index: 3, kind: output, shape index: {}]  }
   0x1   :  { %10 = vsyncpa [#allocation3 + $0x1], 0 }
   0x2   :  { %11 = vsyncpa [#allocation6], 0 }
   0x3   :  { %12 = vsyncpa [#allocation4], 0 }
   0x4   :  { %14 = vsyncpa [#allocation4 + $0x1], 0  ;;  %s619_s12 = smov 0   ;;  %s621_s13 = smov 0  }
   0x5   :  { %s623_s14 = smov 0   ;;  %s625_s15 = smov 0  }
   0x6 LB: > { %s640_s16 = sadd.s32 4294967295, %s590_s15   ;;  %s381_s17 = sadd.s32 4294967294, %s590_s15   ;;  %s590_s15 = sphi %s625_s15, %s807_s15   ;;  %s586_s14 = sphi %s623_s14, %s806_s14   ;;  %s582_s13 = sphi %s621_s13, %s805_s13   ;;  %s578_s12 = sphi %s619_s12, %s804_s12  }
   0x7   : > { %p40_p0 = scmp.ne.s32.totalorder %s582_s13, %s578_s12  ;;  %p786_p1 = scmp.eq.s32.totalorder %s640_s16, 0 }
   0x8   : > { %p112_p3 = scmp.eq.s32.totalorder %s381_s17, 1  ;;  %p382_p5 = scmp.ge.s32.totalorder %s590_s15, 1 }
   0x9   : > { %p649_p4 = por %p786_p1, %p40_p0  ;;  %p119_p7 = scmp.lt.s32.totalorder %s590_s15, 3 }
   0xa   : > { %p654_p6 = por %p112_p3, %p40_p0  ;;  %s592_s21 = smov [#allocation5]  }
   0xb   : > { %s790_s18 = scalar_select %p649_p4, 1, 0 }
   0xc   : > { %s791_s19 = scalar_select %p654_p6, 1, 0 }
   0xd   : > { %p659_p8 = pnand %p382_p5, %p119_p7  ;;  %s131_s22 = sshll.u32 %s592_s21, 4  ;;  %s132_s22 = int_to_ptr.vmem [resolvable:$true] %s131_s22 }
   0xe   : > { %s673_s24 = sadd.s32 1, %s590_s15   ;;  %s27_s25 = sadd.s32 1, %s586_s14 }
   0xf   : > { %s792_s20 = scalar_select %p659_p8, 1, 0 }
  0x10   : > { %p415_p9 = pneg %p659_p8  ;;  %s24_s26 = ssub.s32 %s590_s15, %s673_s24 }
  0x11   : > { %s479_s27 = scalar_lea.vmem %s132_s22, 256  ;;  %p487_p5 = scmp.lt.s32.totalorder %s132_s22, %s132_s22 }
  0x12   : > { %p668_p11 = pnand %p415_p9, %p786_p1  ;;  %p480_p13 = scmp.ne.s32.totalorder %s132_s22, %s479_s27 }
  0x13   : > { %p488_p7 = scmp.lt.s32.totalorder %s479_s27, %s479_s27 }
  0x14   : > { %p470_p12 = pneg %p668_p11 }
  0x15   : > { %p489_p10 = por %p488_p7, %p487_p5 }
  0x16   : > { %p482_p0 = pnand %p480_p13, %p470_p12 }
  0x18   : > { %p483_p3 = pneg %p482_p0 }
  0x1a   : > { %p490_p2 = pnand %p489_p10, %p483_p3 }
  0x1c   : > { %493 = shalt.err (!%p490_p2)
}
  0x1d   : > { %s593_s28 = smov 128   ;;  %s594_s29 = smov 8  }
  0x1e   : > { %418 = dma.hbm_to_vmem [thread:$0]  (!%p668_p11), %s783_s1, 256, %s132_s22, [#allocation6], %s593_s28, %s593_s28, %s594_s29  }
  0x1f   : > { %p25_p9 = scmp.eq.s32.totalorder %s24_s26, 0  ;;  %p34_p12 = scmp.ne.s32.totalorder %s586_s14, %s582_s13 }
  0x20   : > { %p35_p10 = scmp.eq.s32.totalorder %s590_s15, 0  ;;  %p428_p2 = scmp.lt.s32.totalorder %s590_s15, 2 }
  0x21   : > { %s690_s5 = scalar_select %p25_p9, %s586_s14, %s27_s25  }
  0x22   : > { %p36_p13 = por %p35_p10, %p34_p12  ;;  %p794_p0 = scmp.eq.s32.totalorder %s640_s16, 1 }
  0x23   : > { %s148_s7 = sand.u32 1, %s586_s14   ;;  %s386_s8 = sshll.u32 %s590_s15, 7 }
  0x24   : > { %p694_p3 = por %p794_p0, %p34_p12  ;;  %s385_s9 = sshll.u32 %s148_s7, 3 }
  0x25   : > { %s703_s17 = scalar_lea.hbm %s782_s0, %s386_s8  ;;  %s152_s21 = scalar_lea.vmem [#allocation2], %s385_s9 }
  0x26   : > { %s795_s6 = scalar_select %p694_p3, 1, 0 }
  0x27   : > { %s159_s22 = sshll.u32 %s152_s21, 4  ;;  %p705_p11 = pnand %p428_p2, %p36_p13  ;;  %s160_s22 = int_to_ptr.vmem [resolvable:$true] %s159_s22 }
  0x28   : > { %s149_s25 = scalar_lea.sflag [#allocation3], %s148_s7  ;;  %s494_s26 = scalar_lea.hbm %s703_s17, 128 }
  0x29   : > { %p495_p5 = scmp.ne.s32.totalorder %s703_s17, %s494_s26  ;;  %p496_p7 = pneg %p705_p11 }
  0x2a   : > { %s499_s29 = scalar_lea.hbm %s782_s0, 256  ;;  %p500_p10 = scmp.lt.s32.totalorder %s703_s17, %s782_s0 }
  0x2b   : > { %p497_p9 = pnand %p496_p7, %p495_p5  ;;  %p501_p2 = scmp.lt.s32.totalorder %s499_s29, %s494_s26 }
  0x2d   : > { %p498_p12 = pneg %p497_p9  ;;  %p502_p13 = por %p501_p2, %p500_p10 }
  0x2f   : > { %p503_p0 = pnand %p502_p13, %p498_p12 }
  0x31   : > { %506 = shalt.err (!%p503_p0)
}
  0x32   : > { %s507_s8 = scalar_lea.vmem %s160_s22, 128  ;;  %s595_s7 = smov [#allocation2]  }
  0x33   : > { %p508_p1 = scmp.ne.s32.totalorder %s160_s22, %s507_s8  ;;  %s512_s9 = sshll.u32 %s595_s7, 4  ;;  %s513_s9 = int_to_ptr.vmem [resolvable:$false] %s512_s9 }
  0x34   : > { %s514_s10 = scalar_lea.vmem %s513_s9, 256  ;;  %p515_p5 = scmp.lt.s32.totalorder %s160_s22, %s513_s9 }
  0x35   : > { %p510_p6 = pnand %p508_p1, %p496_p7  ;;  %p516_p9 = scmp.lt.s32.totalorder %s514_s10, %s507_s8 }
  0x37   : > { %p511_p3 = pneg %p510_p6  ;;  %p517_p4 = por %p516_p9, %p515_p5 }
  0x39   : > { %p518_p8 = pnand %p517_p4, %p511_p3 }
  0x3b   : > { %521 = shalt.err (!%p518_p8)
}
  0x3c   : > { %422 = dma.hbm_to_vmem [thread:$0]  (!%p705_p11), %s703_s17, 128, %s160_s22, %s149_s25  }
  0x3d   : > { %p797_p12 = scmp.ne.s32.totalorder %s792_s20, 0 }
  0x3e   : > { %s726_s11 = sand.u32 (!%p797_p12), 1, %s582_s13   ;;  %p798_p1 = scmp.ne.s32.totalorder (!%p797_p12), %s790_s18, 0 }
  0x3f   : > { %168 = sbr.rel (%p797_p12) target bundleno = 285 (0x11d), region = 32  ;;  %s388_s21 = sshll.u32 (!%p797_p12), %s726_s11, 3 }
  0x40   : > { %s171_s26 = scalar_lea.sflag (!%p797_p12), [#allocation3], %s726_s11  ;;  %s174_s27 = scalar_lea.vmem (!%p797_p12), [#allocation2], %s388_s21 }
  0x44   : > { %565 = dma.done.wait (%p798_p1), %s171_s26, 128  }
  0x45   : > { %567 = vsyncadd (%p798_p1), %s171_s26, 4294967168  ;;  %p799_p4 = scmp.eq.s32.totalorder %s640_s16, 0 }
  0x47   : > { %569 = dma.done.wait (%p799_p4), [#allocation6], 256   ;;  %p800_p6 = pmov %p799_p4 }
  0x48   : > { %v596_v0 = vmov 0.0   ;;  %vm597_vm0 = vmmov 0   ;;  %v203_v1 = vld [vmem:[#allocation5 + $0x8] sm:$0xff]  ;;  %v202_v2 = vld [vmem:[#allocation5] sm:$0xff]  ;;  %v201_v3 = vld [vmem:[%s174_s27] sm:$0xff]  ;;  %vm211_vm1 = vcmask 130048  }
  0x49   : > { %571 = vsyncadd (%p800_p6), [#allocation6], 4294967040  ;;  %400 = vmatprep.subr.mxu0 %v596_v0  ;;  %404 = vmatprep.mubr.msk.f32.mxu0 %vm597_vm0, %v596_v0  ;;  %v391_v4 = vld [vmem:[%s784_s2] ss:$0 sm:$0xff]  ;;  %s394_s17 = sshll.u32 %s640_s16, 7  ;;  %s200_s22 = scalar_lea.vmem [#allocation7], %s388_s21 }
  0x4a   : > { %401 = vmatpush3.msra.mxu0 %v203_v1  ;;  %s301_s23 = sshll.u32 %s200_s22, 4  ;;  %vm285_vm2 = vcmask 261120   ;;  %s745_s29 = scalar_lea.hbm %s785_s3, %s394_s17  ;;  %s302_s23 = int_to_ptr.vmem [resolvable:$true] %s301_s23 }
  0x4b   : > { %402 = vmatprep.subr.mxu0 %v596_v0  ;;  %s288_s30 = scalar_lea.sflag [#allocation4], %s726_s11  ;;  %s522_s4 = scalar_lea.vmem %s302_s23, 128 }
  0x4c   : > { %403 = vmatpush3.msra.mxu0 %v202_v2  ;;  %p523_p8 = scmp.ne.s32.totalorder %s302_s23, %s522_s4  ;;  %p801_p3 = scmp.ne.s32.totalorder %s795_s6, 0 }
  0x4d   : > { %405 = vmatmul.mubr.msk.f32.vlgmr.msra.gmra.mxu0 %vm211_vm1, %v201_v3  ;;  %s598_s16 = smov [#allocation7]  }
  0x4e   : > { %p524_p11 = pnand %p523_p8, %p801_p3  ;;  %s526_s8 = sshll.u32 %s598_s16, 4  ;;  %s527_s8 = int_to_ptr.vmem [resolvable:$false] %s526_s8 }
  0x4f   : > { %s528_s7 = scalar_lea.vmem %s527_s8, 256  ;;  %p529_p10 = scmp.lt.s32.totalorder %s302_s23, %s527_s8 }
  0x50   : > { %p525_p7 = pneg %p524_p11  ;;  %p530_p2 = scmp.lt.s32.totalorder %s528_s7, %s522_s4 }
  0x52   : > { %p531_p13 = por %p530_p2, %p529_p10 }
  0x54   : > { %p532_p0 = pnand %p531_p13, %p525_p7 }
 0x10d   : > { %v281_v5 = vpop.f32.mrf.mxu0 }
 0x10e   : > { %v282_v6 = vadd.f32 %v391_v4, %v281_v5 }
 0x10f   : > { %v406_v7 = vpop.f32.mrf.mxu0 }
 0x110   : > { %286 = vst.msk [vmem:[%s200_s22] sm:$0xff] %vm285_vm2, %v282_v6 }
 0x111   : > { %535 = shalt.err (!%p532_p0)
}
 0x112   : > { %s536_s9 = scalar_lea.hbm %s745_s29, 128  ;;  %s540_s21 = scalar_lea.hbm %s785_s3, 256 }
 0x113   : > { %p537_p5 = scmp.ne.s32.totalorder %s745_s29, %s536_s9  ;;  %p541_p1 = scmp.lt.s32.totalorder %s745_s29, %s785_s3 }
 0x114   : > { %p542_p4 = scmp.lt.s32.totalorder %s540_s21, %s536_s9 }
 0x115   : > { %p538_p9 = pnand %p537_p5, %p801_p3 }
 0x116   : > { %p543_p6 = por %p542_p4, %p541_p1 }
 0x117   : > { %p539_p12 = pneg %p538_p9 }
 0x119   : > { %p544_p8 = pnand %p543_p6, %p539_p12 }
 0x11b   : > { %547 = shalt.err (!%p544_p8)
}
 0x11c   : > { %413 = dma.vmem_to_hbm [thread:$0]  (%p801_p3), %s302_s23, 128, %s745_s29, %s288_s30  }
 0x11d PF: > { %s313_s18 = sand.u32 1, %s578_s12   ;;  %p802_p11 = scmp.ne.s32.totalorder %s791_s19, 0 }
 0x11e   : > { %p803_p7 = scmp.ge.s32.totalorder %s590_s15, 2  ;;  %s314_s20 = scalar_lea.sflag [#allocation4], %s313_s18 }
 0x120   : > { %p424_p10 = pnand %p803_p7, %p802_p11 }
 0x122   : > { %p425_p2 = pneg %p424_p10 }
 0x124   : > { %573 = dma.done.wait (%p425_p2), %s314_s20, 128  }
 0x125   : > { %575 = vsyncadd (%p425_p2), %s314_s20, 4294967168  ;;  %p17_p13 = scmp.ge.s32.totalorder %s673_s24, 4   ;;  %s804_s12 = smov %s582_s13 }
 0x126   : > { %s805_s13 = smov %s586_s14  ;;  %s806_s14 = smov %s690_s5 }
 0x127   : > { %s807_s15 = smov %s673_s24  ;;  %19 = sbr.rel (!%p17_p13) target bundleno = 6 (0x6), region = 81 }
 0x12c   :  { %319 = vsyncpa [#allocation3], 1 }
 0x12d   :  { %321 = vsyncpa [#allocation3 + $0x1], 1 }
 0x12e   :  { %322 = vsyncpa [#allocation6], 1 }
 0x12f   :  { %323 = vsyncpa [#allocation4], 1 }
 0x130   :  { %325 = vsyncpa [#allocation4 + $0x1], 1 }

</bundles_post_ra>
